<compile_context>
chip_gen: v7x
topology: tpu7x:2x2x1
jax: 0.10.0
libtpu: 0.0.40
codegen_flags: <defaults>
</compile_context>

<pallas_src>
import jax
import jax.numpy as jnp
from jax.experimental import pallas as pl
from jax.experimental.pallas import tpu as pltpu


def _round_up(x, m):
    return ((x + m - 1) // m) * m


def residual_block_kernel(x_ref, w_ref, b_ref, o_ref):
    # x_ref: (TB, Cp)  w_ref: (Cp, Cp)  b_ref: (1, Cp)  o_ref: (TB, Cp)
    x = x_ref[...]
    out = jnp.dot(x, w_ref[...], preferred_element_type=jnp.float32)
    # Bias + residual + ReLU stay fused: VPU filler under the mem-bound regime.
    out = out + b_ref[...] + x.astype(jnp.float32)
    o_ref[...] = jnp.maximum(out, 0.0).astype(o_ref.dtype)


def _tpu_params():
    """(vmem_capacity_bytes, num_tensorcores) with conservative fallbacks."""
    vmem_cap = 128 * 1024 * 1024
    try:
        vmem_cap = int(pltpu.get_tpu_info().vmem_capacity_bytes)
    except Exception:
        pass
    # Dual-TC generations (v7x) expose ~64 MiB VMEM per core; single-TC chips
    # (v5e/v6e) expose 128 MiB — use that as the TensorCore-count heuristic.
    num_tc = 2 if vmem_cap <= 64 * 1024 * 1024 else 1
    return vmem_cap, num_tc


def _pick_group(B, C, target_lanes=256):
    """Lane-packing factor G: pack G batch rows into one (C*G)-wide row so the
    last dim is a multiple of 128 lanes.  G=1 if C is already aligned or no
    divisor of B gives alignment."""
    if C % 128 == 0:
        return 1
    g_max = max(1, target_lanes // C)
    for g in range(g_max, 1, -1):
        if B % g == 0 and (C * g) % 128 == 0:
            return g
    # TODO(synk): batches with no packing-compatible divisor could pad <G rows
    # to still enable packing; kept unpacked (masked stores) for simplicity.
    return 1


def _pick_tile(Bg, Cp, itemsize, num_tc, vmem_budget_bytes):
    """Batch tile in packed rows: moderate tiles for steady-state pipelining,
    >=2 balanced steps only on dual-TC chips, VMEM budget as a hard cap."""
    lane_cp = _round_up(Cp, 128)                # VMEM rows are lane-padded
    fixed = 2 * (Cp * Cp + Cp) * itemsize       # resident weight + bias buffers
    per_row = 2 * 2 * lane_cp * itemsize        # double-buffered x + out tiles
    cap_rows = max((vmem_budget_bytes - fixed) // per_row, 8)
    tb = min(1024, int(cap_rows))               # roofline ~saturates at 512-1024 rows
    if tb >= Bg:
        if num_tc >= 2 and Bg >= 16:
            # Two balanced steps for v7x's TensorCores; round the step UP so the
            # ragged remainder block stays small.
            return int(min(_round_up(pl.cdiv(Bg, 2), 8), Bg if Bg % 8 == 0 else _round_up(pl.cdiv(Bg, 2), 8)))
        return int(Bg)                          # single step; block == full dim is legal
    steps = pl.cdiv(Bg, tb)
    if num_tc >= 2:
        steps = _round_up(steps, num_tc)        # even split across the 2 TCs
    return int(_round_up(pl.cdiv(Bg, steps), 8))


def residual_block(x, weight, bias, *, tb=None, vmem_budget_bytes=None):
    """x: (B, C) float32; weight: (C, C) PyTorch (out, in) layout; bias: (C,)."""
    B, C = x.shape
    itemsize = jnp.dtype(x.dtype).itemsize
    vmem_cap, num_tc = _tpu_params()
    if vmem_budget_bytes is None:
        vmem_budget_bytes = min(32 * 1024 * 1024, vmem_cap // 2)

    # ---- Lane packing (free reshape; weight/bias construction is one-time) ----
    G = _pick_group(B, C)
    Cp = C * G
    Bg = B // G
    xg = x.reshape(Bg, Cp)
    if G > 1:
        # Block-diagonal weight with W^T blocks: folds the (out,in)->(in,out)
        # transpose into the one-time construction (no per-call HLO transpose
        # feeding the kernel beyond this).
        wb = jnp.kron(jnp.eye(G, dtype=weight.dtype), weight.T)
        bb = jnp.tile(bias, (G,)).reshape(1, Cp)
    else:
        wb = weight.T
        bb = bias.reshape(1, Cp)

    if tb is None:
        tb = _pick_tile(Bg, Cp, itemsize, num_tc, vmem_budget_bytes)
    tb = int(min(tb, Bg))
    assert tb == Bg or tb % 8 == 0, "batch tile must be a multiple of 8 or the full packed batch"

    # Ragged grid: last block is masked by Pallas (no jnp.pad / output slice).
    grid = (int(pl.cdiv(Bg, tb)),)

    # VMEM ceiling from the real (128-lane-padded) working set, 2x headroom,
    # capped at 3/4 of physical VMEM (~48 MiB v7x, ~96 MiB v5e/v6e).
    lane_cp = _round_up(Cp, 128)
    working = 2 * (Cp * Cp + Cp) * itemsize + 2 * 2 * tb * lane_cp * itemsize
    vmem_limit = int(min(max(2 * working, 16 * 1024 * 1024), (3 * vmem_cap) // 4))

    # NOTE: weight/bias have constant index_maps; single-buffering them
    # (pipeline_mode=pl.Buffered(1)) only matters once C*G grows large.
    out = pl.pallas_call(
        residual_block_kernel,
        out_shape=jax.ShapeDtypeStruct((Bg, Cp), x.dtype),
        grid_spec=pltpu.PrefetchScalarGridSpec(
            num_scalar_prefetch=0,
            grid=grid,
            in_specs=[
                pl.BlockSpec((tb, Cp), lambda i: (i, 0)),   # streamed x tiles
                pl.BlockSpec((Cp, Cp), lambda i: (0, 0)),   # resident block-diag weight
                pl.BlockSpec((1, Cp), lambda i: (0, 0)),    # resident bias
            ],
            out_specs=pl.BlockSpec((tb, Cp), lambda i: (i, 0)),
        ),
        compiler_params=pltpu.CompilerParams(
            dimension_semantics=("parallel",),
            vmem_limit_bytes=vmem_limit,
        ),
    )(xg, wb, bb)
    return out.reshape(B, C)


def residual_block_ref(x, weight, bias):
    # Pure-JAX reference matching PyTorch semantics.
    out = x @ weight.T + bias
    out = out + x
    return jnp.maximum(out, 0.0)


if __name__ == "__main__":
    key = jax.random.PRNGKey(0)
    kx, kw, kb = jax.random.split(key, 3)

    batch = 8
    num_channels = 32

    x = jax.random.normal(kx, (batch, num_channels), dtype=jnp.float32)
    # Deterministic synthetic parameters (shapes from nn.Linear(C, C)).
    weight = jax.random.normal(kw, (num_channels, num_channels),
                               dtype=jnp.float32) * 0.1
    bias = jax.random.normal(kb, (num_channels,), dtype=jnp.float32) * 0.1

    out = jax.block_until_ready(residual_block(x, weight, bias))
    ref = residual_block_ref(x, weight, bias)
    assert out.shape == (batch, num_channels)
    assert jnp.allclose(out, ref, atol=1e-5, rtol=1e-5)

    # Larger batch: exercises lane-packing (G=8 -> 256-wide rows) + the
    # ragged multi-step grid with masked last block (forced tb=8).
    x2 = jax.random.normal(kx, (200, num_channels), dtype=jnp.float32)
    out2 = jax.block_until_ready(residual_block(x2, weight, bias, tb=8))
    ref2 = residual_block_ref(x2, weight, bias)
    assert out2.shape == (200, num_channels)
    assert jnp.allclose(out2, ref2, atol=1e-5, rtol=1e-5)

    # Default (auto) tiling path for the same batch.
    out3 = jax.block_until_ready(residual_block(x2, weight, bias))
    assert jnp.allclose(out3, ref2, atol=1e-5, rtol=1e-5)

    # Odd batch: no packing factor divides B -> G=1 fallback (narrow last dim).
    x4 = jax.random.normal(kb, (5, num_channels), dtype=jnp.float32)
    out4 = jax.block_until_ready(residual_block(x4, weight, bias))
    assert jnp.allclose(out4, residual_block_ref(x4, weight, bias),
                        atol=1e-5, rtol=1e-5)

    print("KERNEL_OK")
</pallas_src>

<mosaic_0001>
module attributes {stable_mosaic.version = 11 : i64} {
  func.func @residual_block_kernel(%arg0: i32, %arg1: memref<1x256xf32, #tpu.memory_space<vmem>>, %arg2: memref<256x256xf32, #tpu.memory_space<vmem>>, %arg3: memref<1x256xf32, #tpu.memory_space<vmem>>, %arg4: memref<1x256xf32, #tpu.memory_space<vmem>>) attributes {dimension_semantics = [#tpu.dimension_semantics<parallel>], iteration_bounds = array<i64: 1>, scalar_prefetch = 0 : i64, scratch_operands = 0 : i64, tpu.core_type = #tpu.core_type<tc>, window_params = [{transform_indices = @transform_0, window_bounds = array<i64: 1, 256>}, {pipeline_mode = #tpu.pipeline_mode<synchronous>, transform_indices = @transform_1, window_bounds = array<i64: 256, 256>}, {pipeline_mode = #tpu.pipeline_mode<synchronous>, transform_indices = @transform_2, window_bounds = array<i64: 1, 256>}, {transform_indices = @transform_3, window_bounds = array<i64: 1, 256>}]} {
    %c0 = arith.constant 0 : index
    %c0_0 = arith.constant 0 : index
    %0 = vector.load %arg1[%c0, %c0_0] : memref<1x256xf32, #tpu.memory_space<vmem>>, vector<1x256xf32>
    %c0_1 = arith.constant 0 : index
    %c0_2 = arith.constant 0 : index
    %1 = vector.load %arg2[%c0_1, %c0_2] : memref<256x256xf32, #tpu.memory_space<vmem>>, vector<256x256xf32>
    %cst = arith.constant dense<0.000000e+00> : vector<1x256xf32>
    %2 = tpu.matmul %0, %1, %cst {dimension_numbers = #tpu.dot_dimension_numbers<[1], [0], [0], [1], [0, 0, 1, 1], [], []>} : vector<1x256xf32>, vector<256x256xf32>, vector<1x256xf32> -> vector<1x256xf32>
    %c0_3 = arith.constant 0 : index
    %c0_4 = arith.constant 0 : index
    %3 = vector.load %arg3[%c0_3, %c0_4] : memref<1x256xf32, #tpu.memory_space<vmem>>, vector<1x256xf32>
    %4 = arith.addf %2, %3 : vector<1x256xf32>
    %5 = arith.addf %4, %0 : vector<1x256xf32>
    %cst_5 = arith.constant 0.000000e+00 : f32
    %6 = vector.broadcast %cst_5 : f32 to vector<1x256xf32>
    %7 = arith.maximumf %5, %6 : vector<1x256xf32>
    %c0_6 = arith.constant 0 : index
    %c0_7 = arith.constant 0 : index
    %8 = vector.load %arg4[%c0_6, %c0_7] : memref<1x256xf32, #tpu.memory_space<vmem>>, vector<1x256xf32>
    tpu.vector_store %arg4[%c0_6, %c0_7], %7 {strides = array<i32>} : memref<1x256xf32, #tpu.memory_space<vmem>>, vector<1x256xf32>,
    return
  }
  func.func @transform_0(%arg0: i32) -> (i32, i32) {
    %c0_i32 = arith.constant 0 : i32
    %c0_i32_0 = arith.constant 0 : i32
    return %arg0, %c0_i32 : i32, i32
  }
  func.func @transform_1(%arg0: i32) -> (i32, i32) {
    %c0_i32 = arith.constant 0 : i32
    %c0_i32_0 = arith.constant 0 : i32
    %c0_i32_1 = arith.constant 0 : i32
    return %c0_i32, %c0_i32_0 : i32, i32
  }
  func.func @transform_2(%arg0: i32) -> (i32, i32) {
    %c0_i32 = arith.constant 0 : i32
    %c0_i32_0 = arith.constant 0 : i32
    %c0_i32_1 = arith.constant 0 : i32
    return %c0_i32, %c0_i32_0 : i32, i32
  }
  func.func @transform_3(%arg0: i32) -> (i32, i32) {
    %c0_i32 = arith.constant 0 : i32
    %c0_i32_0 = arith.constant 0 : i32
    return %arg0, %c0_i32 : i32, i32
  }
}

</mosaic_0001>

<bundles_post_ra>
// kernel: tpu_custom_call.1
= control target key start
LH: loop header
LB: loop body
LE: loop exit
PB: predicated region body
PF: predicated region fallthrough
CT: control target
= control target key end

     0   :  { %8 = vsyncpa [#allocation3], 0  ;;  %s476_s0 = inlined_call_operand.hbm [shape: f32[1,256], index: 0, kind: input, shape index: {}]   ;;  %s477_s1 = inlined_call_operand.hbm [shape: f32[256,256], index: 1, kind: input, shape index: {}]   ;;  %s478_s2 = inlined_call_operand.vmem [shape: f32[1,256], index: 2, kind: input, shape index: {}]   ;;  %s479_s3 = inlined_call_operand.hbm [shape: f32[1,256], index: 3, kind: output, shape index: {}]  }
   0x1   :  { %9 = vsyncpa [#allocation6], 0 }
   0x2   :  { %10 = vsyncpa [#allocation4], 0  ;;  %s385_s12 = smov [#allocation2]   ;;  %s386_s14 = smov [#allocation5]  }
   0x3   :  { %s17_s13 = sshll.u32 %s385_s12, 4  ;;  %s26_s15 = sshll.u32 %s386_s14, 4  ;;  %s18_s13 = int_to_ptr.vmem [resolvable:$true] %s17_s13  ;;  %s411_s15 = int_to_ptr.vmem [resolvable:$true] %s26_s15 }
   0x4   :  { %s313_s18 = scalar_lea.hbm %s476_s0, 32 }
   0x5   :  { %p314_p0 = scmp.ne.s32.totalorder %s476_s0, %s313_s18  ;;  %p317_p1 = scmp.lt.u32.totalorder %s313_s18, %s476_s0 }
   0x7   :  { %p319_p2 = pnand %p317_p1, %p314_p0 }
   0x9   :  { %322 = shalt.err (!%p319_p2)
}
   0xa   :  { %s323_s23 = scalar_lea.vmem %s18_s13, 32  ;;  %p328_p4 = scmp.lt.s32.totalorder %s18_s13, %s18_s13 }
   0xb   :  { %p324_p3 = scmp.ne.s32.totalorder %s18_s13, %s323_s23  ;;  %p329_p5 = scmp.lt.s32.totalorder %s323_s23, %s323_s23 }
   0xd   :  { %p330_p6 = por %p329_p5, %p328_p4 }
   0xf   :  { %p331_p7 = pnand %p330_p6, %p324_p3 }
  0x11   :  { %334 = shalt.err (!%p331_p7)
}
  0x12   :  { %20 = dma.hbm_to_vmem [thread:$0]  %s476_s0, 32, %s18_s13, [#allocation3]  }
  0x13   :  { %s335_s28 = scalar_lea.hbm %s477_s1, 8192 }
  0x14   :  { %p336_p8 = scmp.ne.s32.totalorder %s477_s1, %s335_s28  ;;  %p339_p9 = scmp.lt.u32.totalorder %s335_s28, %s477_s1 }
  0x16   :  { %p341_p10 = pnand %p339_p9, %p336_p8 }
  0x18   :  { %344 = shalt.err (!%p341_p10)
}
  0x19   :  { %s345_s6 = scalar_lea.vmem %s411_s15, 8192  ;;  %p350_p12 = scmp.lt.s32.totalorder %s411_s15, %s411_s15 }
  0x1a   :  { %p346_p11 = scmp.ne.s32.totalorder %s411_s15, %s345_s6  ;;  %p351_p13 = scmp.lt.s32.totalorder %s345_s6, %s345_s6 }
  0x1c   :  { %p352_p0 = por %p351_p13, %p350_p12 }
  0x1e   :  { %p353_p1 = pnand %p352_p0, %p346_p11 }
  0x20   :  { %356 = shalt.err (!%p353_p1)
}
  0x21   :  { %s387_s0 = smov 256   ;;  %s388_s7 = smov 16  }
  0x22   :  { %32 = dma.hbm_to_vmem [thread:$0]  %s477_s1, 8192, %s411_s15, [#allocation6], %s387_s0, %s387_s0, %s388_s7  }
  0x23   :  { %379 = dma.done.wait [#allocation3], 32  }
  0x24   :  { %380 = vsyncadd [#allocation3], 4294967264 }
  0x25   :  { %381 = dma.done.wait [#allocation6], 8192  }
  0x26   :  { %382 = vsyncadd [#allocation6], 4294959104  ;;  %v43_v0 = vld [vmem:[#allocation5 + $0x8] sm:$0xff]  ;;  %v45_v1 = vld [vmem:[#allocation5 + $0x18] sm:$0xff]  ;;  %v108_v25 = vlaneseq }
  0x27   :  { %v42_v2 = vld [vmem:[#allocation5] sm:$0xff]  ;;  %v243_v3 = vpack.c.bf16 %v45_v1, %v43_v0  ;;  %v44_v4 = vld [vmem:[#allocation5 + $0x10] sm:$0xff]  ;;  %v47_v5 = vld [vmem:[#allocation5 + $0x28] sm:$0xff] }
  0x28   :  { %v49_v6 = vld [vmem:[#allocation5 + $0x38] sm:$0xff]  ;;  %v245_v7 = vpack.c.bf16 %v44_v4, %v42_v2  ;;  %v46_v9 = vld [vmem:[#allocation5 + $0x20] sm:$0xff]  ;;  %v48_v10 = vld [vmem:[#allocation5 + $0x30] sm:$0xff]  ;;  %v443_v32 = vshrl.u32 %v108_v25, 7  ;;  %vm224_vm0 = vcmp.lt.s32.totalorder %v108_v25, 256 }
  0x29   :  { %v247_v8 = vpack.c.bf16 %v49_v6, %v47_v5  ;;  %v51_v11 = vld [vmem:[#allocation5 + $0x48] sm:$0xff]  ;;  %244 = vmatprep.subr.bf16.mxu0 %v243_v3  ;;  %v53_v12 = vld [vmem:[#allocation5 + $0x58] sm:$0xff]  ;;  %v249_v13 = vpack.c.bf16 %v48_v10, %v46_v9  ;;  %v50_v15 = vld [vmem:[#allocation5 + $0x40] sm:$0xff] }
  0x2a   :  { %246 = vmatpush1.bf16.msra.mxu0 %v245_v7  ;;  %v251_v14 = vpack.c.bf16 %v53_v12, %v51_v11  ;;  %v52_v16 = vld [vmem:[#allocation5 + $0x50] sm:$0xff]  ;;  %v55_v17 = vld [vmem:[#allocation5 + $0x68] sm:$0xff]  ;;  %v57_v18 = vld [vmem:[#allocation5 + $0x78] sm:$0xff]  ;;  %v114_v39 = vsub.s32 1, %v443_v32 }
  0x2b   :  { %248 = vmatprep.subr.bf16.mxu0 %v247_v8  ;;  %v253_v19 = vpack.c.bf16 %v52_v16, %v50_v15  ;;  %v255_v20 = vpack.c.bf16 %v57_v18, %v55_v17  ;;  %v54_v21 = vld [vmem:[#allocation5 + $0x60] sm:$0xff]  ;;  %v56_v22 = vld [vmem:[#allocation5 + $0x70] sm:$0xff]  ;;  %v59_v23 = vld [vmem:[#allocation5 + $0x88] sm:$0xff] }
  0x2c   :  { %v61_v24 = vld [vmem:[#allocation5 + $0x98] sm:$0xff]  ;;  %v257_v26 = vpack.c.bf16 %v56_v22, %v54_v21  ;;  %v58_v28 = vld [vmem:[#allocation5 + $0x80] sm:$0xff]  ;;  %v60_v29 = vld [vmem:[#allocation5 + $0x90] sm:$0xff] }
  0x2d   :  { %v259_v27 = vpack.c.bf16 %v61_v24, %v59_v23  ;;  %v63_v30 = vld [vmem:[#allocation5 + $0xa8] sm:$0xff]  ;;  %v65_v31 = vld [vmem:[#allocation5 + $0xb8] sm:$0xff]  ;;  %v261_v33 = vpack.c.bf16 %v60_v29, %v58_v28  ;;  %v62_v35 = vld [vmem:[#allocation5 + $0xa0] sm:$0xff] }
  0x2e   :  { %250 = vmatpush1.bf16.msra.mxu0 %v249_v13  ;;  %v263_v34 = vpack.c.bf16 %v65_v31, %v63_v30  ;;  %v64_v36 = vld [vmem:[#allocation5 + $0xb0] sm:$0xff]  ;;  %v67_v37 = vld [vmem:[#allocation5 + $0xc8] sm:$0xff]  ;;  %v69_v38 = vld [vmem:[#allocation5 + $0xd8] sm:$0xff] }
  0x2f   :  { %252 = vmatprep.subr.bf16.mxu0 %v251_v14  ;;  %v265_v40 = vpack.c.bf16 %v64_v36, %v62_v35  ;;  %v267_v41 = vpack.c.bf16 %v69_v38, %v67_v37  ;;  %v66_v42 = vld [vmem:[#allocation5 + $0xc0] sm:$0xff]  ;;  %v68_v43 = vld [vmem:[#allocation5 + $0xd0] sm:$0xff]  ;;  %v446_v44 = vld [vmem:[#allocation2] sm:$0x3]  ;;  %v110_v38 = vsub.s32 0, %v443_v32 }
  0x30   :  { %v71_v45 = vld [vmem:[#allocation5 + $0xe8] sm:$0xff]  ;;  %v73_v46 = vld [vmem:[#allocation5 + $0xf8] sm:$0xff]  ;;  %v451_v47 = vrot.slane %v446_v44, %v114_v39  ;;  %v269_v48 = vpack.c.bf16 %v68_v43, %v66_v42  ;;  %v70_v50 = vld [vmem:[#allocation5 + $0xe0] sm:$0xff] }
  0x31   :  { %v271_v49 = vpack.c.bf16 %v73_v46, %v71_v45  ;;  %v72_v51 = vld [vmem:[#allocation5 + $0xf0] sm:$0xff]  ;;  %v75_v52 = vld [vmem:[#allocation5 + $0x108] sm:$0xff]  ;;  %v77_v53 = vld [vmem:[#allocation5 + $0x118] sm:$0xff]  ;;  %v389_v46 = vmov 1966171168  }
  0x32   :  { %254 = vmatpush1.bf16.msra.mxu0 %v253_v19  ;;  %193 = vmatprep.mubr.f32.mxu0 %v451_v47  ;;  %v273_v54 = vpack.c.bf16 %v72_v51, %v70_v50  ;;  %v275_v55 = vpack.c.bf16 %v77_v53, %v75_v52  ;;  %v74_v56 = vld [vmem:[#allocation5 + $0x100] sm:$0xff]  ;;  %v76_v57 = vld [vmem:[#allocation5 + $0x110] sm:$0xff]  ;;  %v79_v58 = vld [vmem:[#allocation5 + $0x128] sm:$0xff] }
  0x33   :  { %256 = vmatprep.subr.bf16.mxu0 %v255_v20  ;;  %v81_v59 = vld [vmem:[#allocation5 + $0x138] sm:$0xff]  ;;  %v277_v60 = vpack.c.bf16 %v76_v57, %v74_v56  ;;  %v78_v62 = vld [vmem:[#allocation5 + $0x120] sm:$0xff]  ;;  %v80_v63 = vld [vmem:[#allocation5 + $0x130] sm:$0xff] }
  0x34   :  { %v279_v61 = vpack.c.bf16 %v81_v59, %v79_v58  ;;  %v83_v0 = vld [vmem:[#allocation5 + $0x148] sm:$0xff]  ;;  %v85_v1 = vld [vmem:[#allocation5 + $0x158] sm:$0xff]  ;;  %v281_v2 = vpack.c.bf16 %v80_v63, %v78_v62  ;;  %v82_v4 = vld [vmem:[#allocation5 + $0x140] sm:$0xff] }
  0x35   :  { %v283_v3 = vpack.c.bf16 %v85_v1, %v83_v0  ;;  %v84_v5 = vld [vmem:[#allocation5 + $0x150] sm:$0xff]  ;;  %v87_v6 = vld [vmem:[#allocation5 + $0x168] sm:$0xff]  ;;  %v89_v7 = vld [vmem:[#allocation5 + $0x178] sm:$0xff] }
  0x36   :  { %258 = vmatpush1.bf16.msra.mxu0 %v257_v26  ;;  %v285_v8 = vpack.c.bf16 %v84_v5, %v82_v4  ;;  %v287_v9 = vpack.c.bf16 %v89_v7, %v87_v6  ;;  %v86_v10 = vld [vmem:[#allocation5 + $0x160] sm:$0xff]  ;;  %v88_v11 = vld [vmem:[#allocation5 + $0x170] sm:$0xff]  ;;  %v91_v12 = vld [vmem:[#allocation5 + $0x188] sm:$0xff] }
  0x37   :  { %260 = vmatprep.subr.bf16.mxu0 %v259_v27  ;;  %v93_v13 = vld [vmem:[#allocation5 + $0x198] sm:$0xff]  ;;  %v289_v14 = vpack.c.bf16 %v88_v11, %v86_v10  ;;  %v90_v16 = vld [vmem:[#allocation5 + $0x180] sm:$0xff]  ;;  %v92_v17 = vld [vmem:[#allocation5 + $0x190] sm:$0xff] }
  0x38   :  { %v291_v15 = vpack.c.bf16 %v93_v13, %v91_v12  ;;  %v95_v18 = vld [vmem:[#allocation5 + $0x1a8] sm:$0xff]  ;;  %v97_v19 = vld [vmem:[#allocation5 + $0x1b8] sm:$0xff]  ;;  %v293_v20 = vpack.c.bf16 %v92_v17, %v90_v16  ;;  %v94_v22 = vld [vmem:[#allocation5 + $0x1a0] sm:$0xff] }
  0x39   :  { %v295_v21 = vpack.c.bf16 %v97_v19, %v95_v18  ;;  %v96_v23 = vld [vmem:[#allocation5 + $0x1b0] sm:$0xff]  ;;  %v99_v24 = vld [vmem:[#allocation5 + $0x1c8] sm:$0xff]  ;;  %v101_v26 = vld [vmem:[#allocation5 + $0x1d8] sm:$0xff] }
  0x3a   :  { %262 = vmatpush1.bf16.msra.mxu0 %v261_v33  ;;  %v297_v27 = vpack.c.bf16 %v96_v23, %v94_v22  ;;  %v299_v28 = vpack.c.bf16 %v101_v26, %v99_v24  ;;  %v98_v29 = vld [vmem:[#allocation5 + $0x1c0] sm:$0xff]  ;;  %v100_v30 = vld [vmem:[#allocation5 + $0x1d0] sm:$0xff]  ;;  %v103_v31 = vld [vmem:[#allocation5 + $0x1e8] sm:$0xff] }
  0x3b   :  { %264 = vmatprep.subr.bf16.mxu0 %v263_v34  ;;  %v105_v33 = vld [vmem:[#allocation5 + $0x1f8] sm:$0xff]  ;;  %v301_v34 = vpack.c.bf16 %v100_v30, %v98_v29  ;;  %v102_v36 = vld [vmem:[#allocation5 + $0x1e0] sm:$0xff]  ;;  %v104_v37 = vld [vmem:[#allocation5 + $0x1f0] sm:$0xff] }
  0x3c   :  { %v303_v35 = vpack.c.bf16 %v105_v33, %v103_v31  ;;  %v106_v42 = vld [vmem:[%s478_s2] sm:$0x3]  ;;  %s390_s2 = smov [#allocation7]  }
  0x3d   :  { %v122_v43 = vrot.slane %v106_v42, %v110_v38  ;;  %v126_v45 = vrot.slane %v106_v42, %v114_v39  ;;  %s233_s11 = sshll.u32 %s390_s2, 4  ;;  %s234_s11 = int_to_ptr.vmem [resolvable:$true] %s233_s11 }
  0x3e   :  { %266 = vmatpush1.bf16.msra.mxu0 %v265_v40  ;;  %v305_v40 = vpack.c.bf16 %v104_v37, %v102_v36  ;;  %s357_s12 = scalar_lea.vmem %s234_s11, 32  ;;  %p362_p3 = scmp.lt.s32.totalorder %s234_s11, %s234_s11 }
  0x3f   :  { %268 = vmatprep.subr.bf16.mxu0 %v267_v41  ;;  %v111_v41 = vrot.slane %v446_v44, %v110_v38  ;;  %p358_p2 = scmp.ne.s32.totalorder %s234_s11, %s357_s12  ;;  %p363_p4 = scmp.lt.s32.totalorder %s357_s12, %s357_s12 }
  0x41   :  { %p364_p5 = por %p363_p4, %p362_p3 }
  0x42   :  { %270 = vmatpush1.bf16.msra.mxu0 %v269_v48  ;;  %v208_v48 = vunpack.c.l.s4 %v389_v46 }
  0x43   :  { %272 = vmatprep.subr.bf16.mxu0 %v271_v49  ;;  %p365_p6 = pnand %p364_p5, %p358_p2 }
  0x44   :  { %v209_v53 = vunpack.c.0.s8 %v208_v48 }
  0x46   :  { %274 = vmatpush1.bf16.msra.mxu0 %v273_v54  ;;  %v212_v57 = vsub.s32 %v209_v53, %v443_v32 }
  0x47   :  { %276 = vmatprep.subr.bf16.mxu0 %v275_v55 }
  0x4a   :  { %278 = vmatpush1.bf16.msra.mxu0 %v277_v60 }
  0x4b   :  { %280 = vmatprep.subr.bf16.mxu0 %v279_v61 }
  0x4e   :  { %282 = vmatpush1.bf16.msra.mxu0 %v281_v2 }
  0x4f   :  { %284 = vmatprep.subr.bf16.mxu0 %v283_v3 }
  0x52   :  { %286 = vmatpush1.bf16.msra.mxu0 %v285_v8 }
  0x53   :  { %288 = vmatprep.subr.bf16.mxu0 %v287_v9 }
  0x56   :  { %290 = vmatpush1.bf16.msra.mxu0 %v289_v14 }
  0x57   :  { %292 = vmatprep.subr.bf16.mxu0 %v291_v15 }
  0x5a   :  { %294 = vmatpush1.bf16.msra.mxu0 %v293_v20 }
  0x5b   :  { %296 = vmatprep.subr.bf16.mxu0 %v295_v21 }
  0x5e   :  { %298 = vmatpush1.bf16.msra.mxu0 %v297_v27 }
  0x5f   :  { %300 = vmatprep.subr.bf16.mxu0 %v299_v28 }
  0x62   :  { %302 = vmatpush1.bf16.msra.mxu0 %v301_v34 }
  0x63   :  { %304 = vmatprep.subr.bf16.mxu0 %v303_v35 }
  0x66   :  { %306 = vmatpush1.bf16.msra.mxu0 %v305_v40 }
  0x69   :  { %194 = vmatmul.mubr.f32.vlgmr.msra.gmra.mrb[0].mxu0 %v111_v41 }
 0x13c   :  { %v195_v49 = vpop.f32.mrb[0].mxu0 }
 0x13d   :  { %v196_v50 = vadd.f32 %v195_v49, %v122_v43  ;;  %v197_v51 = vpop.f32.mrb[1].mxu0 }
 0x13e   :  { %v198_v52 = vadd.f32 %v197_v51, %v126_v45 }
 0x13f   :  { %v200_v54 = vadd.f32 %v196_v50, %v111_v41 }
 0x140   :  { %v201_v44 = vadd.f32 %v198_v52, %v451_v47 }
 0x141   :  { %v202_v55 = vmax.f32 %v200_v54, 0.0 }
 0x142   :  { %v203_v56 = vmax.f32 %v201_v44, 0.0 }
 0x144   :  { %v206_v58 = vcombine.low %v202_v55, %v203_v56 }
 0x146   :  { %v213_v59 = vrot.slane %v206_v58, %v212_v57 }
 0x148   :  { %v220_v39 = vrot.slane %v213_v59, %v212_v57 }
 0x14a   :  { %226 = vst.msk [vmem:[#allocation7] sm:$0x3] %vm224_vm0, %v220_v39 }
 0x14b   :  { %368 = shalt.err (!%p365_p6)
}
 0x14c   :  { %s369_s15 = scalar_lea.hbm %s479_s3, 32 }
 0x14d   :  { %p370_p7 = scmp.ne.s32.totalorder %s479_s3, %s369_s15  ;;  %p373_p8 = scmp.lt.u32.totalorder %s369_s15, %s479_s3 }
 0x14f   :  { %p375_p9 = pnand %p373_p8, %p370_p7 }
 0x151   :  { %378 = shalt.err (!%p375_p9)
}
 0x152   :  { %236 = dma.vmem_to_hbm [thread:$0]  %s234_s11, 32, %s479_s3, [#allocation4]  }
 0x153   :  { %383 = dma.done.wait [#allocation4], 32  }
 0x154   :  { %384 = vsyncadd [#allocation4], 4294967264 }
 0x155   :  { %240 = vsyncpa [#allocation3], 1 }
 0x156   :  { %241 = vsyncpa [#allocation6], 1 }
 0x157   :  { %242 = vsyncpa [#allocation4], 1 }

</bundles_post_ra>
